<compile_context>
chip_gen: v6e
topology: v6e:2x2x1
jax: 0.10.0
libtpu: 0.0.40
codegen_flags: <defaults>
</compile_context>

<pallas_src>
import jax
import jax.numpy as jnp
from jax import lax
from jax.experimental import pallas as pl
from jax.experimental.pallas import tpu as pltpu


def _cdiv(a, b):
    return -(-a // b)


def _round_up(a, b):
    return _cdiv(a, b) * b


def _conv1x1_kernel(x_ref, w_ref, b_ref, o_ref):
    # x_ref: (tm, D)  pixel tile (channels-last, last timestep), bf16/f32
    # w_ref: (C, D)   1x1-conv weight (same dtype as x), resident across grid
    # b_ref: (C, 1)   f32 bias column, resident across grid
    # o_ref: (C, tm)  lane-dense output tile
    acc = lax.dot_general(
        w_ref[...], x_ref[...],
        dimension_numbers=(((1,), (1,)), ((), ())),   # contract over D
        preferred_element_type=jnp.float32,
    )
    o_ref[...] = (acc + b_ref[...]).astype(o_ref.dtype)


def _vmem_capacity_bytes():
    try:
        return int(pltpu.get_tpu_info().vmem_capacity_bytes)
    except Exception:
        return 64 * 1024 * 1024        # conservative default: v7x per-TC VMEM


def _pick_tm(P, B, in_itemsize, out_itemsize, n_in_bufs, vmem_cap, max_tm):
    # Per-pixel-row VMEM cost: the (tm, D<=128) input tile is lane-padded to
    # 128 lanes per buffer; the (C, tm) output tile is sublane-padded to 8.
    budget = int(vmem_cap * 0.6)
    per_row = n_in_bufs * 128 * in_itemsize + 2 * 8 * out_itemsize
    cap = max(128, (budget // per_row) // 128 * 128)
    cap = min(cap, max_tm)
    tm = P if P <= cap else cap
    n_tiles = _cdiv(P, tm)
    # Megacore balance (v7x: 2 TensorCores): if B alone can't split evenly and
    # the pixel axis collapsed to one tile, split it so no core sits idle.
    if n_tiles == 1 and (B % 2 == 1) and P >= 256:
        tm = min(cap, _round_up(_cdiv(P, 2), 128))
        n_tiles = _cdiv(P, tm)
    return tm, n_tiles


def _build_conv1x1_call(*, B, T, P, D, C, tm, n_tiles, out_dtype,
                        vmem_limit_bytes, cost_estimate, input_buffers):
    feats_kwargs = {}
    if input_buffers > 2 and hasattr(pl, "Buffered"):
        # Deeper input pipeline: compute per step is trivial, so a third
        # buffer hides the writeback/step-boundary bubble.
        feats_kwargs["pipeline_mode"] = pl.Buffered(input_buffers)

    return pl.pallas_call(
        _conv1x1_kernel,
        out_shape=jax.ShapeDtypeStruct((B, C, P), out_dtype),
        grid_spec=pltpu.PrefetchScalarGridSpec(
            num_scalar_prefetch=0,
            grid=(n_tiles, B),
            in_specs=[
                # Fused last-timestep select: block of 1 (squeezed) along B
                # and T, timestep T-1 indexed directly -> kernel sees (tm, D).
                pl.BlockSpec((None, None, tm, D),
                             lambda i, b: (b, T - 1, i, 0),
                             **feats_kwargs),
                pl.BlockSpec((C, D), lambda i, b: (0, 0)),   # weight, resident
                pl.BlockSpec((C, 1), lambda i, b: (0, 0)),   # bias, resident
            ],
            # Lane-dense (C, tm) output tile -> unmasked 128-lane stores; the
            # (B, C, P) result reshapes to NCHW for free.
            out_specs=pl.BlockSpec((None, C, tm), lambda i, b: (b, 0, i)),
        ),
        compiler_params=pltpu.CompilerParams(
            dimension_semantics=("parallel", "parallel"),
            vmem_limit_bytes=vmem_limit_bytes),
        cost_estimate=cost_estimate,
    )


def conv1x1_pixelwise_lasttime(feats_btpd, weight, bias, *, out_dtype=None,
                               max_tm=16384, input_buffers=3):
    """feats_btpd: [B, T, P, D]; weight: [C, D]; bias: [C] -> logits [B, C, P].

    Only timestep T-1 is ever DMA'd from HBM (fused select via index_map).
    The MXU accumulates in f32 regardless of the feature dtype.
    """
    B, T, P, D = feats_btpd.shape
    C = weight.shape[0]
    assert max_tm % 128 == 0

    if out_dtype is None:
        out_dtype = feats_btpd.dtype

    in_itemsize = jnp.dtype(feats_btpd.dtype).itemsize
    out_itemsize = jnp.dtype(out_dtype).itemsize
    n_bufs_plan = max(input_buffers, 2)

    vmem_cap = _vmem_capacity_bytes()
    tm, n_tiles = _pick_tm(P, B, in_itemsize, out_itemsize,
                           n_bufs_plan, vmem_cap, max_tm)

    # VMEM budget for the chosen tiles (lane/sublane padded), with headroom;
    # needed because v5e's scoped default is only 16 MiB.
    need = (n_bufs_plan * tm * 128 * in_itemsize
            + 2 * _round_up(C, 8) * tm * out_itemsize
            + (1 << 20))                                  # weight/bias/slack
    vmem_limit = int(min(max(need * 2, 32 << 20),
                         max(vmem_cap - (8 << 20), need + (2 << 20))))

    # Advisory: mark the call as bandwidth-heavy so XLA overlaps neighbors.
    cost = pl.CostEstimate(
        flops=2 * B * P * C * D,
        transcendentals=0,
        bytes_accessed=(B * P * D * in_itemsize          # feature read
                        + B * P * C * out_itemsize        # logits write
                        + C * (D + 1) * 4),               # weight + bias
    )

    # Only the MXU touches the (possibly bf16) features/weight; the bias add
    # stays on the f32 accumulator (safe on v5e: no bf16 VPU needed).
    w_cast = weight.astype(feats_btpd.dtype)
    b_col = bias.astype(jnp.float32).reshape(C, 1)

    last_err = None
    for n_bufs in sorted({n_bufs_plan, 2}, reverse=True):
        try:
            call = _build_conv1x1_call(
                B=B, T=T, P=P, D=D, C=C, tm=tm, n_tiles=n_tiles,
                out_dtype=out_dtype, vmem_limit_bytes=vmem_limit,
                cost_estimate=cost, input_buffers=n_bufs)
            return call(feats_btpd, w_cast, b_col)
        except Exception as e:   # pragma: no cover - conservative fallback
            last_err = e
    raise last_err


def pixelwise_patch_classifier_forward(feats, weight, bias, *, out_dtype=None):
    """Forward pass of PixelwisePatchClassifier given encoder features.

    feats:  [B, T, H, W, D] encoder output after the squeeze(1) loop, kept in
            whatever dtype the encoder emits (bf16 is the intended fast path).
    weight: [num_classes, D]  (Conv2d 1x1 weight with kernel dims squeezed)
    bias:   [num_classes]
    returns logits in NCHW: [B, num_classes, H, W]
    """
    B, T, H, W, D = feats.shape
    C = weight.shape[0]

    # Metadata-only collapse of the spatial dims (contiguous -> free).
    feats_btpd = feats.reshape(B, T, H * W, D)

    out = conv1x1_pixelwise_lasttime(feats_btpd, weight, bias,
                                     out_dtype=out_dtype)      # [B, C, H*W]

    # Already channel-major: a free reshape gives NCHW, matching Conv2d.
    return out.reshape(B, C, H, W)


if __name__ == "__main__":
    # Small deterministic example shapes consistent with the forward.
    B, T, H, W, D = 2, 3, 16, 16, 32      # D == encoder.embedding_size
    num_classes = 5

    key = jax.random.PRNGKey(0)
    k_feats, k_w, k_b = jax.random.split(key, 3)

    # Synthetic encoder features (stand-in for encode_features output), kept
    # in bf16: only the dominant HBM read stream is narrow, accumulation is
    # still f32 on the MXU.
    feats = jax.random.normal(k_feats, (B, T, H, W, D), dtype=jnp.bfloat16)

    # Deterministic Conv2d(D, num_classes, kernel_size=1) parameters.
    weight = jax.random.normal(k_w, (num_classes, D), dtype=jnp.float32) * 0.05
    bias = jax.random.normal(k_b, (num_classes,), dtype=jnp.float32) * 0.01

    logits = pixelwise_patch_classifier_forward(feats, weight, bias)
    logits = jax.block_until_ready(logits)

    # Reference check in plain JAX (same math as the PyTorch 1x1 conv),
    # computed in f32 on the bf16-cast inputs; tolerance sized for bf16
    # weight cast + bf16 output rounding.
    ref = (jnp.einsum("bhwd,cd->bchw",
                      feats[:, -1].astype(jnp.float32), weight)
           + bias[None, :, None, None])
    assert logits.shape == (B, num_classes, H, W)
    assert logits.dtype == feats.dtype
    assert jnp.allclose(logits.astype(jnp.float32), ref, atol=3e-2, rtol=3e-2)

    print("KERNEL_OK")
</pallas_src>

<mosaic_0001>
module attributes {stable_mosaic.version = 11 : i64} {
  func.func @_conv1x1_kernel(%arg0: i32, %arg1: i32, %arg2: memref<1x1x256x32xbf16, #tpu.memory_space<vmem>>, %arg3: memref<5x32xbf16, #tpu.memory_space<vmem>>, %arg4: memref<5x1xf32, #tpu.memory_space<vmem>>, %arg5: memref<1x5x256xbf16, #tpu.memory_space<vmem>>) attributes {dimension_semantics = [#tpu.dimension_semantics<parallel>, #tpu.dimension_semantics<parallel>], iteration_bounds = array<i64: 1, 2>, scalar_prefetch = 0 : i64, scratch_operands = 0 : i64, tpu.core_type = #tpu.core_type<tc>, window_params = [{transform_indices = @transform_0, window_bounds = array<i64: 1, 1, 256, 32>}, {pipeline_mode = #tpu.pipeline_mode<synchronous>, transform_indices = @transform_1, window_bounds = array<i64: 5, 32>}, {pipeline_mode = #tpu.pipeline_mode<synchronous>, transform_indices = @transform_2, window_bounds = array<i64: 5, 1>}, {transform_indices = @transform_3, window_bounds = array<i64: 1, 5, 256>}]} {
    %c0 = arith.constant 0 : index
    %c0_0 = arith.constant 0 : index
    %0 = vector.load %arg3[%c0, %c0_0] : memref<5x32xbf16, #tpu.memory_space<vmem>>, vector<5x32xbf16>
    %c0_1 = arith.constant 0 : index
    %c0_2 = arith.constant 0 : index
    %c0_3 = arith.constant 0 : index
    %c0_4 = arith.constant 0 : index
    %1 = vector.load %arg2[%c0_1, %c0_2, %c0_3, %c0_4] : memref<1x1x256x32xbf16, #tpu.memory_space<vmem>>, vector<1x1x256x32xbf16>
    %2 = vector.shape_cast %1 : vector<1x1x256x32xbf16> to vector<256x32xbf16>
    %cst = arith.constant dense<0.000000e+00> : vector<5x256xf32>
    %3 = tpu.matmul %0, %2, %cst {dimension_numbers = #tpu.dot_dimension_numbers<[1], [1], [0], [0], [0, 0, 1, 0], [], []>} : vector<5x32xbf16>, vector<256x32xbf16>, vector<5x256xf32> -> vector<5x256xf32>
    %c0_5 = arith.constant 0 : index
    %c0_6 = arith.constant 0 : index
    %4 = vector.load %arg4[%c0_5, %c0_6] : memref<5x1xf32, #tpu.memory_space<vmem>>, vector<5x1xf32>
    %5 = vector.broadcast %4 : vector<5x1xf32> to vector<5x256xf32>
    %6 = arith.addf %3, %5 : vector<5x256xf32>
    %7 = arith.truncf %6 : vector<5x256xf32> to vector<5x256xbf16>
    %c0_7 = arith.constant 0 : index
    %c0_8 = arith.constant 0 : index
    %c0_9 = arith.constant 0 : index
    %8 = vector.load %arg5[%c0_7, %c0_8, %c0_9] : memref<1x5x256xbf16, #tpu.memory_space<vmem>>, vector<1x5x256xbf16>
    %9 = vector.shape_cast %8 : vector<1x5x256xbf16> to vector<5x256xbf16>
    %10 = vector.shape_cast %7 : vector<5x256xbf16> to vector<1x5x256xbf16>
    tpu.vector_store %arg5[%c0_7, %c0_8, %c0_9], %10 {strides = array<i32>} : memref<1x5x256xbf16, #tpu.memory_space<vmem>>, vector<1x5x256xbf16>,
    return
  }
  func.func @transform_0(%arg0: i32, %arg1: i32) -> (i32, i32, i32, i32) {
    %c2_i32 = arith.constant 2 : i32
    %c0_i32 = arith.constant 0 : i32
    %c0_i32_0 = arith.constant 0 : i32
    return %arg1, %c2_i32, %arg0, %c0_i32 : i32, i32, i32, i32
  }
  func.func @transform_1(%arg0: i32, %arg1: i32) -> (i32, i32) {
    %c0_i32 = arith.constant 0 : i32
    %c0_i32_0 = arith.constant 0 : i32
    %c0_i32_1 = arith.constant 0 : i32
    return %c0_i32, %c0_i32_0 : i32, i32
  }
  func.func @transform_2(%arg0: i32, %arg1: i32) -> (i32, i32) {
    %c0_i32 = arith.constant 0 : i32
    %c0_i32_0 = arith.constant 0 : i32
    %c0_i32_1 = arith.constant 0 : i32
    return %c0_i32, %c0_i32_0 : i32, i32
  }
  func.func @transform_3(%arg0: i32, %arg1: i32) -> (i32, i32, i32) {
    %c0_i32 = arith.constant 0 : i32
    %c0_i32_0 = arith.constant 0 : i32
    return %arg1, %c0_i32, %arg0 : i32, i32, i32
  }
}

</mosaic_0001>

<bundles_post_ra>
// kernel: tpu_custom_call.1
= control target key start
LH: loop header
LB: loop body
LE: loop exit
PB: predicated region body
PF: predicated region fallthrough
CT: control target
= control target key end

     0   :  { %s709_s12 = smov 0   ;;  %s711_s13 = smov 0   ;;  %s788_s0 = inlined_call_operand.vmem [shape: bf16[2,3,256,32], index: 0, kind: input, shape index: {}]   ;;  %s789_s1 = inlined_call_operand.vmem [shape: bf16[5,32], index: 1, kind: input, shape index: {}]   ;;  %s790_s2 = inlined_call_operand.vmem [shape: f32[5,1], index: 2, kind: input, shape index: {}]   ;;  %s791_s3 = inlined_call_operand.vmem [shape: bf16[2,5,256], index: 3, kind: output, shape index: {}]  }
   0x1   :  { %s713_s14 = smov 0  }
   0x2 LB: > { %s22_s15 = sadd.s32 1, %s682_s13  ;;  %p538_p0 = scmp.ge.s32.totalorder %s686_s14, 1  ;;  %s686_s14 = sphi %s713_s14, %s13_s14   ;;  %s682_s13 = sphi %s711_s13, %s793_s13   ;;  %s678_s12 = sphi %s709_s12, %s792_s12  }
   0x3   : > { %p23_p1 = scmp.ge.s32.totalorder %s22_s15, 2  ;;  %p159_p2 = scmp.lt.s32.totalorder %s686_s14, 3 }
   0x5   : > { %s795_s15 = smov (%p23_p1, %s22_s15), 0  ;;  %p160_p3 = pnand %p538_p0, %p159_p2 }
   0x6   : > { %p193_p4 = scmp.lt.s32.totalorder (!%p160_p3), %s678_s12, 1 }
   0x7   : > { %163 = sbr.rel (%p160_p3) target bundleno = 283 (0x11b), region = 32 }
   0xc   : > { %vm333_vm0 = vcmask 261120   ;;  %v214_v0 = vld [vmem:[%s789_s1] sm:$0x7]  ;;  %v688_v1 = vmov 0   ;;  %s797_s12 = smov (!%p193_p4, %s678_s12), 1  ;;  %vm434_vm1 = vcmask 1042432  }
   0xd   : > { %612 = vmatprep.mubr.msk.bf16.mxu0 %vm333_vm0, %v214_v0  ;;  %647 = vset.pattern.permute.xlu0 %v688_v1  ;;  %v247_v2 = vld [vmem:[%s790_s2] sm:$0x1f]  ;;  %s539_s20 = smul.u32 384, %s797_s12  ;;  %vm435_vm2 = vsmask.f32 2304  ;;  %s594_s24 = sshll.u32 %s797_s12, 3 }
   0xe   : > { %250 = vperm.xlu0 %647, %v247_v2   ;;  %vm437_vm3 = vcmask 1046532   ;;  %vm438_vm4 = vsmask.f32 6400  ;;  %vm436_vm5 = vmand %vm434_vm1, %vm435_vm2  ;;  %s211_s27 = scalar_lea.vmem %s791_s3, %s594_s24 }
   0xf   : > { %s740_s23 = scalar_lea.vmem %s788_s0, %s539_s20  ;;  %vm439_vm6 = vmand %vm437_vm3, %vm438_vm4  ;;  %v441_v32 = vld [vmem:[%s211_s27] sm:$0x77] }
  0x10   : > { %v648_v3 = vld [vmem:[%s740_s23 + $0x178] sm:$0xff]   ;;  %v650_v5 = vld [vmem:[%s740_s23 + $0x170] sm:$0xff]   ;;  %v652_v9 = vld [vmem:[%s740_s23 + $0x168] sm:$0xff]  }
  0x11   : > { %v649_v4 = vld [vmem:[%s740_s23 + $0x138] sm:$0xff]   ;;  %614 = vmatprep.subr.msk.bf16.mxu0 %vm333_vm0, %v648_v3  ;;  %v651_v7 = vld [vmem:[%s740_s23 + $0x130] sm:$0xff]   ;;  %v653_v10 = vld [vmem:[%s740_s23 + $0x128] sm:$0xff]  }
  0x12   : > { %v359_v6 = vsel %vm333_vm0, %v649_v4, 0  ;;  %v356_v8 = vsel %vm333_vm0, %v651_v7, 0  ;;  %v353_v11 = vsel %vm333_vm0, %v653_v10, 0  ;;  %v654_v12 = vld [vmem:[%s740_s23 + $0x160] sm:$0xff]   ;;  %v656_v15 = vld [vmem:[%s740_s23 + $0x158] sm:$0xff]   ;;  %v658_v18 = vld [vmem:[%s740_s23 + $0x150] sm:$0xff]  }
  0x13   : > { %597 = vmatpush3.bf16.xpose.msra.mxu0 %v359_v6  ;;  %v655_v13 = vld [vmem:[%s740_s23 + $0x120] sm:$0xff]   ;;  %v657_v16 = vld [vmem:[%s740_s23 + $0x118] sm:$0xff]   ;;  %v659_v19 = vld [vmem:[%s740_s23 + $0x110] sm:$0xff]  }
  0x14   : > { %615 = vmatprep.subr.msk.bf16.mxu0 %vm333_vm0, %v650_v5  ;;  %v350_v14 = vsel %vm333_vm0, %v655_v13, 0  ;;  %v347_v17 = vsel %vm333_vm0, %v657_v16, 0  ;;  %v344_v20 = vsel %vm333_vm0, %v659_v19, 0  ;;  %v660_v21 = vld [vmem:[%s740_s23 + $0x148] sm:$0xff]   ;;  %v662_v24 = vld [vmem:[%s740_s23 + $0x140] sm:$0xff]   ;;  %vm440_vm7 = vmor %vm439_vm6, %vm436_vm5 }
  0x15   : > { %v661_v22 = vld [vmem:[%s740_s23 + $0x108] sm:$0xff]   ;;  %v663_v25 = vld [vmem:[%s740_s23 + $0x100] sm:$0xff]  }
  0x16   : > { %v341_v23 = vsel %vm333_vm0, %v661_v22, 0  ;;  %v338_v26 = vsel %vm333_vm0, %v663_v25, 0 }
  0x1b   : > { %599 = vmatpush3.bf16.xpose.msra.mxu0 %v356_v8 }
  0x1c   : > { %616 = vmatprep.subr.msk.bf16.mxu0 %vm333_vm0, %v652_v9 }
  0x23   : > { %601 = vmatpush3.bf16.xpose.msra.mxu0 %v353_v11 }
  0x24   : > { %617 = vmatprep.subr.msk.bf16.mxu0 %vm333_vm0, %v654_v12 }
  0x2b   : > { %603 = vmatpush3.bf16.xpose.msra.mxu0 %v350_v14 }
  0x2c   : > { %618 = vmatprep.subr.msk.bf16.mxu0 %vm333_vm0, %v656_v15 }
  0x33   : > { %605 = vmatpush3.bf16.xpose.msra.mxu0 %v347_v17 }
  0x34   : > { %619 = vmatprep.subr.msk.bf16.mxu0 %vm333_vm0, %v658_v18 }
  0x3b   : > { %607 = vmatpush3.bf16.xpose.msra.mxu0 %v344_v20 }
  0x3c   : > { %620 = vmatprep.subr.msk.bf16.mxu0 %vm333_vm0, %v660_v21 }
  0x43   : > { %609 = vmatpush3.bf16.xpose.msra.mxu0 %v341_v23 }
  0x44   : > { %621 = vmatprep.subr.msk.bf16.mxu0 %vm333_vm0, %v662_v24 }
  0x4b   : > { %611 = vmatpush3.bf16.xpose.msra.mxu0 %v338_v26 }
  0x52   : > { %613 = vmatmul.mubr.msk.bf16.vlgmr.msra.gmra.mxu0 %vm333_vm0, %v214_v0 }
  0x89   : > { %v251_v27 = vpop.permute.xlu0 %250 }
 0x112   : > { %v419_v28 = vpop.f32.mrf.mxu0 }
 0x113   : > { %v420_v30 = vadd.f32 %v419_v28, %v251_v27 }
 0x114   : > { %v421_v29 = vpop.f32.mrf.mxu0 }
 0x115   : > { %v422_v31 = vadd.f32 %v421_v29, %v251_v27 }
 0x116   : > { %v423_v33 = vpop.f32.mrf.mxu0 }
 0x117   : > { %v595_v34 = vpack.c.bf16 %v422_v31, %v420_v30 }
 0x118   : > { %v424_v35 = vpop.f32.mrf.mxu0 }
 0x119   : > { %v442_v36 = vsel %vm440_vm7, %v595_v34, %v441_v32 }
 0x11a   : > { %443 = vst [vmem:[%s211_s27] sm:$0x77] %v442_v36 }
 0x11b PF: > { %s13_s14 = sadd.s32 1, %s686_s14   ;;  %s792_s12 = smov %s682_s13 }
 0x11c   : > { %p10_p5 = scmp.ge.s32.totalorder %s13_s14, 4   ;;  %s793_s13 = smov %s795_s15 }
 0x11e   :  { %12 = sbr.rel (!%p10_p5) target bundleno = 2 (0x2), region = 62 }

</bundles_post_ra>
